<compile_context>
chip_gen: v6e
topology: v6e:2x2x1
jax: 0.10.0
libtpu: 0.0.40
codegen_flags: <defaults>
</compile_context>

<pallas_src>
import numpy as np
import jax
import jax.numpy as jnp
from jax.experimental import pallas as pl
from jax.experimental.pallas import tpu as pltpu


# ----------------------------------------------------------------------------
# Kernel
# ----------------------------------------------------------------------------
def make_critic_kernel(features):
    def critic_kernel(sm_ref, am_ref, b1s_ref, w1_ref, w2s_ref, b2s_ref,
                      w2a_ref, w3s_ref, b3s_ref, out_ref):
        # sm_ref : [tb, G*S]  bf16   masked state  (one-hot folded on host)
        # am_ref : [tb, G*A]  bf16   masked action
        # b1s_ref: [tb, H1]   f32    per-row selected b1
        # w1_ref : [G*S, H1]  bf16   stacked per-game w1 (zero-padded rows)
        # w2s_ref: [H1, H2]   bf16   shared layer
        # b2s_ref: [1, H2]    f32
        # w2a_ref: [G*A, H2]  bf16   stacked per-game w2_a
        # w3s_ref: [tb, H2]   f32    per-row selected head weight
        # b3s_ref: [tb, 1]    f32    per-row selected head bias
        h1 = jnp.maximum(
            jnp.dot(sm_ref[...], w1_ref[...],
                    preferred_element_type=jnp.float32) + b1s_ref[...],
            0.0)
        h2 = (jnp.dot(h1.astype(jnp.bfloat16), w2s_ref[...],
                      preferred_element_type=jnp.float32)
              + jnp.dot(am_ref[...], w2a_ref[...],
                        preferred_element_type=jnp.float32)
              + b2s_ref[...])

        if features == 'relu':
            h_f = jnp.maximum(h2, 0.0)
        elif features == 'sigmoid':
            h_f = jax.nn.sigmoid(h2)
        else:
            raise ValueError(features)

        # selection-first head: only the row's own head is ever computed.
        out_ref[...] = (jnp.sum(h_f * w3s_ref[...], axis=1, keepdims=True)
                        + b3s_ref[...])

    return critic_kernel


# ----------------------------------------------------------------------------
# Wrapper
# ----------------------------------------------------------------------------
def _round_up(x, m):
    return (x + m - 1) // m * m


def _pad_rows(x, n_rows):
    pad = n_rows - x.shape[0]
    if pad == 0:
        return x
    return jnp.pad(x, ((0, pad), (0, 0)))


def critic_forward(state, action, idx_np, params, features='relu',
                   max_tile_b=128):
    """Forward pass matching torch CriticNetwork.forward semantics.

    Output row r corresponds to the group-reordered (stably-sorted-by-idx)
    batch, with head gathered by idx in ORIGINAL order — exactly what the
    torch `torch.cat(h2)` + `q.gather(1, idx)` code produces.
    """
    idx_np = np.asarray(idx_np).astype(np.int32)
    # torch.cat over groups (sorted unique idx, increasing row index within
    # each group) == stable argsort permutation.  Host glue.
    perm = np.argsort(idx_np, kind='stable')

    G, s_max, H1 = params['w1'].shape
    a_max = params['w2a'].shape[1]
    H2 = params['w2s'].shape[1]
    B = state.shape[0]
    Ks, Ka = G * s_max, G * a_max

    state_p = jnp.asarray(state, jnp.float32)[perm]
    action_p = jnp.asarray(action, jnp.float32)[perm]
    idx_perm = jnp.asarray(idx_np[perm])
    idx_orig = jnp.asarray(idx_np)

    # Fold the per-row game one-hot into the LHS (exact 0/1 masking, done once
    # on the host) so each layer is a single batched matmul in the kernel.
    game_oh = jax.nn.one_hot(idx_perm, G, dtype=jnp.float32)          # [B, G]
    sm = (game_oh[:, :, None] * state_p[:, None, :]).reshape(B, Ks)
    am = (game_oh[:, :, None] * action_p[:, None, :]).reshape(B, Ka)
    b1_sel = game_oh @ params['b1']                                   # [B, H1]

    # Selection-first head (idx in ORIGINAL order, as in torch gather).
    w3_sel = params['w3t'].T[idx_orig]                                # [B, H2]
    b3_sel = params['b3'][0][idx_orig][:, None]                       # [B, 1]

    # Batch tiling: sublane-aligned tile, capped at 128 rows.
    B8 = _round_up(B, 8)
    tb = min(max_tile_b, B8)
    B_pad = _round_up(B8, tb)
    grid = (B_pad // tb,)

    # bf16 matmul operands, f32 everywhere else.
    sm_b = _pad_rows(sm, B_pad).astype(jnp.bfloat16)
    am_b = _pad_rows(am, B_pad).astype(jnp.bfloat16)
    b1_sel = _pad_rows(b1_sel, B_pad)
    w3_sel = _pad_rows(w3_sel, B_pad)
    b3_sel = _pad_rows(b3_sel, B_pad)
    w1_flat = params['w1'].reshape(Ks, H1).astype(jnp.bfloat16)
    w2a_flat = params['w2a'].reshape(Ka, H2).astype(jnp.bfloat16)
    w2s = params['w2s'].astype(jnp.bfloat16)
    b2s = params['b2s']                                               # f32

    out = pl.pallas_call(
        make_critic_kernel(features),
        out_shape=jax.ShapeDtypeStruct((B_pad, 1), jnp.float32),
        grid=grid,
        in_specs=[
            pl.BlockSpec((tb, Ks), lambda i: (i, 0)),     # masked state
            pl.BlockSpec((tb, Ka), lambda i: (i, 0)),     # masked action
            pl.BlockSpec((tb, H1), lambda i: (i, 0)),     # b1 per row
            pl.BlockSpec((Ks, H1), lambda i: (0, 0)),     # w1 (replicated)
            pl.BlockSpec((H1, H2), lambda i: (0, 0)),     # w2s (replicated)
            pl.BlockSpec((1, H2), lambda i: (0, 0)),      # b2s (replicated)
            pl.BlockSpec((Ka, H2), lambda i: (0, 0)),     # w2a (replicated)
            pl.BlockSpec((tb, H2), lambda i: (i, 0)),     # w3 per row
            pl.BlockSpec((tb, 1), lambda i: (i, 0)),      # b3 per row
        ],
        out_specs=pl.BlockSpec((tb, 1), lambda i: (i, 0)),
        compiler_params=pltpu.CompilerParams(
            dimension_semantics=("parallel",)),
    )(sm_b, am_b, b1_sel, w1_flat, w2s, b2s, w2a_flat, w3_sel, b3_sel)

    return out[:B, 0]


# ----------------------------------------------------------------------------
# Parameter init (mirrors the torch module's init)
# ----------------------------------------------------------------------------
def init_params(key, input_shape, n_actions_per_head, n_hidden_1, n_hidden_2):
    n_games = len(input_shape)
    s_max = max(s[0] for s in input_shape)
    a_max = max(a[0] for a in n_actions_per_head)
    keys = iter(jax.random.split(key, 5 * n_games + 2))

    def unif(k, shape, bound):
        return jax.random.uniform(k, shape, jnp.float32, -bound, bound)

    w1 = jnp.zeros((n_games, s_max, n_hidden_1), jnp.float32)
    b1 = jnp.zeros((n_games, n_hidden_1), jnp.float32)
    w2a = jnp.zeros((n_games, a_max, n_hidden_2), jnp.float32)
    w3t = jnp.zeros((n_hidden_2, n_games), jnp.float32)
    b3 = jnp.zeros((1, n_games), jnp.float32)
    for i in range(n_games):
        d_s = input_shape[i][0]
        d_a = n_actions_per_head[i][0]
        bnd1 = 1.0 / np.sqrt(d_s)
        w1 = w1.at[i, :d_s, :].set(unif(next(keys), (d_s, n_hidden_1), bnd1))
        b1 = b1.at[i].set(unif(next(keys), (n_hidden_1,), bnd1))
        bnd_a = 1.0 / np.sqrt(d_a)
        w2a = w2a.at[i, :d_a, :].set(unif(next(keys), (d_a, n_hidden_2), bnd_a))
        w3t = w3t.at[:, i].set(unif(next(keys), (n_hidden_2,), 0.003))
        b3 = b3.at[0, i].set(unif(next(keys), (), 0.003))
    bnd2 = 1.0 / np.sqrt(n_hidden_1)
    w2s = unif(next(keys), (n_hidden_1, n_hidden_2), bnd2)
    b2s = unif(next(keys), (1, n_hidden_2), bnd2)
    return dict(w1=w1, b1=b1, w2s=w2s, b2s=b2s, w2a=w2a, w3t=w3t, b3=b3)


# ----------------------------------------------------------------------------
# Reference (numpy, emulating bf16 matmul operands + f32 accumulation)
# ----------------------------------------------------------------------------
def _bf16(x):
    return np.asarray(
        jnp.asarray(np.asarray(x, np.float32)).astype(jnp.bfloat16)
        .astype(jnp.float32))


def reference_forward(state, action, idx_np, params, input_shape,
                      n_actions_per_head, features='relu'):
    """Re-implementation of the torch forward with bf16-rounded matmul inputs."""
    state = np.asarray(state, np.float32)
    action = np.asarray(action, np.float32)
    idx_np = np.asarray(idx_np).astype(np.int32)
    w1 = np.asarray(params['w1']); b1 = np.asarray(params['b1'])
    w2s = np.asarray(params['w2s']); b2s = np.asarray(params['b2s'])
    w2a = np.asarray(params['w2a']); w3t = np.asarray(params['w3t'])
    b3 = np.asarray(params['b3'])

    h2_list = []
    for i in np.unique(idx_np):
        rows = np.argwhere(idx_np == i).ravel()
        d_s = input_shape[i][0]
        d_a = n_actions_per_head[i][0]
        h1 = np.maximum(
            _bf16(state[rows, :d_s]) @ _bf16(w1[i, :d_s, :]) + b1[i], 0.0)
        h2_list.append(_bf16(h1) @ _bf16(w2s) + b2s[0]
                       + _bf16(action[rows, :d_a]) @ _bf16(w2a[i, :d_a, :]))
    cat_h2 = np.concatenate(h2_list, axis=0)
    if features == 'relu':
        h_f = np.maximum(cat_h2, 0.0)
    else:
        h_f = 1.0 / (1.0 + np.exp(-cat_h2))
    q = np.einsum('bd,bd->b', h_f, w3t.T[idx_np]) + b3[0, idx_np]
    return q.astype(np.float32)


# ----------------------------------------------------------------------------
if __name__ == "__main__":
    key = jax.random.PRNGKey(0)
    # Module config: 2 games, per-game obs dims (6, 8), per-game action dims (3, 4)
    input_shape = [(6,), (8,)]
    n_actions_per_head = [(3,), (4,)]
    n_hidden_1, n_hidden_2 = 32, 32
    s_max = max(s[0] for s in input_shape)
    a_max = max(a[0] for a in n_actions_per_head)

    k_s, k_a, k_p, k_s2, k_a2 = jax.random.split(key, 5)
    params = init_params(k_p, input_shape, n_actions_per_head,
                         n_hidden_1, n_hidden_2)

    # --- test 1: B=8, single batch tile, both feature nonlinearities ---------
    B = 8
    state = jax.random.normal(k_s, (B, s_max), jnp.float32)
    action = jax.random.normal(k_a, (B, a_max), jnp.float32)
    idx_np = np.array([1, 0, 1, 0, 0, 1, 1, 0], dtype=np.int32)

    for features in ('relu', 'sigmoid'):
        q = critic_forward(state, action, idx_np, params, features=features)
        jax.block_until_ready(q)
        assert q.shape == (B,)
        q_ref = reference_forward(state, action, idx_np, params, input_shape,
                                  n_actions_per_head, features=features)
        np.testing.assert_allclose(np.asarray(q), q_ref, rtol=2e-3, atol=2e-4)

    # --- test 2: B=20 (needs padding), tile=8 -> grid of 3 batch tiles -------
    B2 = 20
    state2 = jax.random.normal(k_s2, (B2, s_max), jnp.float32)
    action2 = jax.random.normal(k_a2, (B2, a_max), jnp.float32)
    idx2 = np.tile(np.array([0, 1, 1, 0, 1], dtype=np.int32), 4)[:B2]
    q2 = critic_forward(state2, action2, idx2, params, features='relu',
                        max_tile_b=8)
    jax.block_until_ready(q2)
    assert q2.shape == (B2,)
    q2_ref = reference_forward(state2, action2, idx2, params, input_shape,
                               n_actions_per_head, features='relu')
    np.testing.assert_allclose(np.asarray(q2), q2_ref, rtol=2e-3, atol=2e-4)

    print("KERNEL_OK")
</pallas_src>

<mosaic_0001>
module attributes {stable_mosaic.version = 11 : i64} {
  func.func @critic_kernel(%arg0: i32, %arg1: memref<8x16xbf16, #tpu.memory_space<vmem>>, %arg2: memref<8x8xbf16, #tpu.memory_space<vmem>>, %arg3: memref<8x32xf32, #tpu.memory_space<vmem>>, %arg4: memref<16x32xbf16, #tpu.memory_space<vmem>>, %arg5: memref<32x32xbf16, #tpu.memory_space<vmem>>, %arg6: memref<1x32xf32, #tpu.memory_space<vmem>>, %arg7: memref<8x32xbf16, #tpu.memory_space<vmem>>, %arg8: memref<8x32xf32, #tpu.memory_space<vmem>>, %arg9: memref<8x1xf32, #tpu.memory_space<vmem>>, %arg10: memref<8x1xf32, #tpu.memory_space<vmem>>) attributes {dimension_semantics = [#tpu.dimension_semantics<parallel>], iteration_bounds = array<i64: 1>, scalar_prefetch = 0 : i64, scratch_operands = 0 : i64, tpu.core_type = #tpu.core_type<tc>, window_params = [{transform_indices = @transform_0, window_bounds = array<i64: 8, 16>}, {transform_indices = @transform_1, window_bounds = array<i64: 8, 8>}, {transform_indices = @transform_2, window_bounds = array<i64: 8, 32>}, {pipeline_mode = #tpu.pipeline_mode<synchronous>, transform_indices = @transform_3, window_bounds = array<i64: 16, 32>}, {pipeline_mode = #tpu.pipeline_mode<synchronous>, transform_indices = @transform_4, window_bounds = array<i64: 32, 32>}, {pipeline_mode = #tpu.pipeline_mode<synchronous>, transform_indices = @transform_5, window_bounds = array<i64: 1, 32>}, {pipeline_mode = #tpu.pipeline_mode<synchronous>, transform_indices = @transform_6, window_bounds = array<i64: 8, 32>}, {transform_indices = @transform_7, window_bounds = array<i64: 8, 32>}, {transform_indices = @transform_8, window_bounds = array<i64: 8, 1>}, {transform_indices = @transform_9, window_bounds = array<i64: 8, 1>}]} {
    %c0 = arith.constant 0 : index
    %c0_0 = arith.constant 0 : index
    %0 = vector.load %arg1[%c0, %c0_0] : memref<8x16xbf16, #tpu.memory_space<vmem>>, vector<8x16xbf16>
    %c0_1 = arith.constant 0 : index
    %c0_2 = arith.constant 0 : index
    %1 = vector.load %arg4[%c0_1, %c0_2] : memref<16x32xbf16, #tpu.memory_space<vmem>>, vector<16x32xbf16>
    %cst = arith.constant dense<0.000000e+00> : vector<8x32xf32>
    %2 = tpu.matmul %0, %1, %cst {dimension_numbers = #tpu.dot_dimension_numbers<[1], [0], [0], [1], [0, 0, 1, 1], [], []>} : vector<8x16xbf16>, vector<16x32xbf16>, vector<8x32xf32> -> vector<8x32xf32>
    %c0_3 = arith.constant 0 : index
    %c0_4 = arith.constant 0 : index
    %3 = vector.load %arg3[%c0_3, %c0_4] : memref<8x32xf32, #tpu.memory_space<vmem>>, vector<8x32xf32>
    %4 = arith.addf %2, %3 : vector<8x32xf32>
    %cst_5 = arith.constant 0.000000e+00 : f32
    %5 = vector.broadcast %cst_5 : f32 to vector<8x32xf32>
    %6 = arith.maximumf %4, %5 : vector<8x32xf32>
    %7 = arith.truncf %6 : vector<8x32xf32> to vector<8x32xbf16>
    %c0_6 = arith.constant 0 : index
    %c0_7 = arith.constant 0 : index
    %8 = vector.load %arg5[%c0_6, %c0_7] : memref<32x32xbf16, #tpu.memory_space<vmem>>, vector<32x32xbf16>
    %cst_8 = arith.constant dense<0.000000e+00> : vector<8x32xf32>
    %9 = tpu.matmul %7, %8, %cst_8 {dimension_numbers = #tpu.dot_dimension_numbers<[1], [0], [0], [1], [0, 0, 1, 1], [], []>} : vector<8x32xbf16>, vector<32x32xbf16>, vector<8x32xf32> -> vector<8x32xf32>
    %c0_9 = arith.constant 0 : index
    %c0_10 = arith.constant 0 : index
    %10 = vector.load %arg2[%c0_9, %c0_10] : memref<8x8xbf16, #tpu.memory_space<vmem>>, vector<8x8xbf16>
    %c0_11 = arith.constant 0 : index
    %c0_12 = arith.constant 0 : index
    %11 = vector.load %arg7[%c0_11, %c0_12] : memref<8x32xbf16, #tpu.memory_space<vmem>>, vector<8x32xbf16>
    %cst_13 = arith.constant dense<0.000000e+00> : vector<8x32xf32>
    %12 = tpu.matmul %10, %11, %cst_13 {dimension_numbers = #tpu.dot_dimension_numbers<[1], [0], [0], [1], [0, 0, 1, 1], [], []>} : vector<8x8xbf16>, vector<8x32xbf16>, vector<8x32xf32> -> vector<8x32xf32>
    %13 = arith.addf %9, %12 : vector<8x32xf32>
    %c0_14 = arith.constant 0 : index
    %c0_15 = arith.constant 0 : index
    %14 = vector.load %arg6[%c0_14, %c0_15] : memref<1x32xf32, #tpu.memory_space<vmem>>, vector<1x32xf32>
    %15 = vector.broadcast %14 : vector<1x32xf32> to vector<8x32xf32>
    %16 = arith.addf %13, %15 : vector<8x32xf32>
    %cst_16 = arith.constant 0.000000e+00 : f32
    %17 = vector.broadcast %cst_16 : f32 to vector<8x32xf32>
    %18 = arith.maximumf %16, %17 : vector<8x32xf32>
    %c0_17 = arith.constant 0 : index
    %c0_18 = arith.constant 0 : index
    %19 = vector.load %arg8[%c0_17, %c0_18] : memref<8x32xf32, #tpu.memory_space<vmem>>, vector<8x32xf32>
    %20 = arith.mulf %18, %19 : vector<8x32xf32>
    %cst_19 = arith.constant dense<0.000000e+00> : vector<8xf32>
    %21 = vector.multi_reduction <add>, %20, %cst_19 [1] : vector<8x32xf32> to vector<8xf32>
    %22 = vector.shape_cast %21 : vector<8xf32> to vector<8x1xf32>
    %c0_20 = arith.constant 0 : index
    %c0_21 = arith.constant 0 : index
    %23 = vector.load %arg9[%c0_20, %c0_21] : memref<8x1xf32, #tpu.memory_space<vmem>>, vector<8x1xf32>
    %24 = arith.addf %22, %23 : vector<8x1xf32>
    %c0_22 = arith.constant 0 : index
    %c0_23 = arith.constant 0 : index
    %25 = vector.load %arg10[%c0_22, %c0_23] : memref<8x1xf32, #tpu.memory_space<vmem>>, vector<8x1xf32>
    tpu.vector_store %arg10[%c0_22, %c0_23], %24 {strides = array<i32>} : memref<8x1xf32, #tpu.memory_space<vmem>>, vector<8x1xf32>,
    return
  }
  func.func @transform_0(%arg0: i32) -> (i32, i32) {
    %c0_i32 = arith.constant 0 : i32
    %c0_i32_0 = arith.constant 0 : i32
    return %arg0, %c0_i32 : i32, i32
  }
  func.func @transform_1(%arg0: i32) -> (i32, i32) {
    %c0_i32 = arith.constant 0 : i32
    %c0_i32_0 = arith.constant 0 : i32
    return %arg0, %c0_i32 : i32, i32
  }
  func.func @transform_2(%arg0: i32) -> (i32, i32) {
    %c0_i32 = arith.constant 0 : i32
    %c0_i32_0 = arith.constant 0 : i32
    return %arg0, %c0_i32 : i32, i32
  }
  func.func @transform_3(%arg0: i32) -> (i32, i32) {
    %c0_i32 = arith.constant 0 : i32
    %c0_i32_0 = arith.constant 0 : i32
    %c0_i32_1 = arith.constant 0 : i32
    return %c0_i32, %c0_i32_0 : i32, i32
  }
  func.func @transform_4(%arg0: i32) -> (i32, i32) {
    %c0_i32 = arith.constant 0 : i32
    %c0_i32_0 = arith.constant 0 : i32
    %c0_i32_1 = arith.constant 0 : i32
    return %c0_i32, %c0_i32_0 : i32, i32
  }
  func.func @transform_5(%arg0: i32) -> (i32, i32) {
    %c0_i32 = arith.constant 0 : i32
    %c0_i32_0 = arith.constant 0 : i32
    %c0_i32_1 = arith.constant 0 : i32
    return %c0_i32, %c0_i32_0 : i32, i32
  }
  func.func @transform_6(%arg0: i32) -> (i32, i32) {
    %c0_i32 = arith.constant 0 : i32
    %c0_i32_0 = arith.constant 0 : i32
    %c0_i32_1 = arith.constant 0 : i32
    return %c0_i32, %c0_i32_0 : i32, i32
  }
  func.func @transform_7(%arg0: i32) -> (i32, i32) {
    %c0_i32 = arith.constant 0 : i32
    %c0_i32_0 = arith.constant 0 : i32
    return %arg0, %c0_i32 : i32, i32
  }
  func.func @transform_8(%arg0: i32) -> (i32, i32) {
    %c0_i32 = arith.constant 0 : i32
    %c0_i32_0 = arith.constant 0 : i32
    return %arg0, %c0_i32 : i32, i32
  }
  func.func @transform_9(%arg0: i32) -> (i32, i32) {
    %c0_i32 = arith.constant 0 : i32
    %c0_i32_0 = arith.constant 0 : i32
    return %arg0, %c0_i32 : i32, i32
  }
}

</mosaic_0001>

<bundles_post_ra>
// kernel: tpu_custom_call.1
= control target key start
LH: loop header
LB: loop body
LE: loop exit
PB: predicated region body
PF: predicated region fallthrough
CT: control target
= control target key end

     0   :  { %14 = vsyncpa [#allocation3], 0  ;;  %s570_s0 = inlined_call_operand.hbm [shape: bf16[8,16], index: 0, kind: input, shape index: {}]   ;;  %s571_s1 = inlined_call_operand.hbm [shape: bf16[8,8], index: 1, kind: input, shape index: {}]   ;;  %s572_s2 = inlined_call_operand.hbm [shape: f32[8,32], index: 2, kind: input, shape index: {}]   ;;  %s573_s3 = inlined_call_operand.hbm [shape: bf16[16,32], index: 3, kind: input, shape index: {}]   ;;  %s574_s4 = inlined_call_operand.vmem [shape: bf16[32,32], index: 4, kind: input, shape index: {}]   ;;  %s575_s5 = inlined_call_operand.vmem [shape: f32[1,32], index: 5, kind: input, shape index: {}]   ;;  %s576_s6 = inlined_call_operand.hbm [shape: bf16[8,32], index: 6, kind: input, shape index: {}]   ;;  %s577_s7 = inlined_call_operand.hbm [shape: f32[8,32], index: 7, kind: input, shape index: {}]   ;;  %s578_s8 = inlined_call_operand.vmem [shape: f32[8,1], index: 8, kind: input, shape index: {}]   ;;  %s579_s9 = inlined_call_operand.vmem [shape: f32[8,1], index: 9, kind: output, shape index: {}]  }
   0x1   :  { %15 = vsyncpa [#allocation5], 0 }
   0x2   :  { %16 = vsyncpa [#allocation8], 0 }
   0x3   :  { %17 = vsyncpa [#allocation11], 0  ;;  %s472_s30 = smov [#allocation4]   ;;  %s473_s11 = smov [#allocation7]  }
   0x4   :  { %s34_s10 = sshll.u32 %s472_s30, 4  ;;  %s53_s12 = sshll.u32 %s473_s11, 4  ;;  %s35_s10 = int_to_ptr.vmem [resolvable:$true] %s34_s10  ;;  %s54_s12 = int_to_ptr.vmem [resolvable:$true] %s53_s12 }
   0x5   :  { %s352_s13 = scalar_lea.vmem %s35_s10, 64  ;;  %p357_p1 = scmp.lt.s32.totalorder %s35_s10, %s35_s10 }
   0x6   :  { %p353_p0 = scmp.ne.s32.totalorder %s35_s10, %s352_s13  ;;  %p358_p2 = scmp.lt.s32.totalorder %s352_s13, %s352_s13 }
   0x8   :  { %p359_p3 = por %p358_p2, %p357_p1 }
   0xa   :  { %p360_p4 = pnand %p359_p3, %p353_p0 }
   0xc   :  { %363 = shalt.err (!%p360_p4)
}
   0xd   :  { %37 = dma.hbm_to_vmem [thread:$0]  %s571_s1, 64, %s35_s10, [#allocation5]  }
   0xe   :  { %s372_s16 = scalar_lea.vmem %s54_s12, 128  ;;  %p377_p6 = scmp.lt.s32.totalorder %s54_s12, %s54_s12 }
   0xf   :  { %p373_p5 = scmp.ne.s32.totalorder %s54_s12, %s372_s16  ;;  %p378_p7 = scmp.lt.s32.totalorder %s372_s16, %s372_s16 }
  0x11   :  { %p379_p8 = por %p378_p7, %p377_p6 }
  0x13   :  { %p380_p9 = pnand %p379_p8, %p373_p5 }
  0x15   :  { %383 = shalt.err (!%p380_p9)
}
  0x16   :  { %s474_s17 = smov 64   ;;  %s475_s18 = smov 4  }
  0x17   :  { %59 = dma.hbm_to_vmem [thread:$0]  %s573_s3, 128, %s54_s12, [#allocation8], %s474_s17, %s474_s17, %s475_s18  }
  0x18   :  { %s476_s21 = smov [#allocation2]   ;;  %s477_s23 = smov [#allocation6]  }
  0x19   :  { %s24_s22 = sshll.u32 %s476_s21, 4  ;;  %s44_s24 = sshll.u32 %s477_s23, 4  ;;  %s25_s22 = int_to_ptr.vmem [resolvable:$true] %s24_s22  ;;  %s45_s24 = int_to_ptr.vmem [resolvable:$true] %s44_s24 }
  0x1a   :  { %s392_s1 = scalar_lea.vmem %s25_s22, 64  ;;  %p397_p11 = scmp.lt.s32.totalorder %s25_s22, %s25_s22 }
  0x1b   :  { %p393_p10 = scmp.ne.s32.totalorder %s25_s22, %s392_s1  ;;  %p398_p12 = scmp.lt.s32.totalorder %s392_s1, %s392_s1 }
  0x1d   :  { %p399_p13 = por %p398_p12, %p397_p11 }
  0x1f   :  { %p400_p0 = pnand %p399_p13, %p393_p10 }
  0x21   :  { %403 = shalt.err (!%p400_p0)
}
  0x22   :  { %27 = dma.hbm_to_vmem [thread:$0]  %s570_s0, 64, %s25_s22, [#allocation3]  }
  0x23   :  { %s412_s27 = scalar_lea.vmem %s45_s24, 128  ;;  %p417_p2 = scmp.lt.s32.totalorder %s45_s24, %s45_s24 }
  0x24   :  { %p413_p1 = scmp.ne.s32.totalorder %s45_s24, %s412_s27  ;;  %p418_p3 = scmp.lt.s32.totalorder %s412_s27, %s412_s27 }
  0x26   :  { %p419_p4 = por %p418_p3, %p417_p2 }
  0x28   :  { %p420_p5 = pnand %p419_p4, %p413_p1 }
  0x2a   :  { %423 = shalt.err (!%p420_p5)
}
  0x2b   :  { %47 = dma.hbm_to_vmem [thread:$0]  %s572_s2, 128, %s45_s24, [#allocation5]  }
  0x2c   :  { %s478_s29 = smov [#allocation9]   ;;  %s479_s10 = smov [#allocation10]  }
  0x2d   :  { %s70_s30 = sshll.u32 %s478_s29, 4  ;;  %s80_s11 = sshll.u32 %s479_s10, 4  ;;  %s71_s30 = int_to_ptr.vmem [resolvable:$true] %s70_s30  ;;  %s81_s11 = int_to_ptr.vmem [resolvable:$true] %s80_s11 }
  0x2e   :  { %s432_s12 = scalar_lea.vmem %s71_s30, 64  ;;  %p437_p7 = scmp.lt.s32.totalorder %s71_s30, %s71_s30 }
  0x2f   :  { %p433_p6 = scmp.ne.s32.totalorder %s71_s30, %s432_s12  ;;  %p438_p8 = scmp.lt.s32.totalorder %s432_s12, %s432_s12 }
  0x31   :  { %p439_p9 = por %p438_p8, %p437_p7 }
  0x33   :  { %p440_p10 = pnand %p439_p9, %p433_p6 }
  0x35   :  { %443 = shalt.err (!%p440_p10)
}
  0x36   :  { %73 = dma.hbm_to_vmem [thread:$0]  %s576_s6, 64, %s71_s30, [#allocation8]  }
  0x37   :  { %s452_s14 = scalar_lea.vmem %s81_s11, 128  ;;  %p457_p12 = scmp.lt.s32.totalorder %s81_s11, %s81_s11 }
  0x38   :  { %p453_p11 = scmp.ne.s32.totalorder %s81_s11, %s452_s14  ;;  %p458_p13 = scmp.lt.s32.totalorder %s452_s14, %s452_s14 }
  0x3a   :  { %p459_p0 = por %p458_p13, %p457_p12 }
  0x3c   :  { %p460_p1 = pnand %p459_p0, %p453_p11 }
  0x3e   :  { %463 = shalt.err (!%p460_p1)
}
  0x3f   :  { %83 = dma.hbm_to_vmem [thread:$0]  %s577_s7, 128, %s81_s11, [#allocation11]  }
  0x40   :  { %464 = dma.done.wait [#allocation3], 64  }
  0x41   :  { %465 = vsyncadd [#allocation3], 4294967232 }
  0x42   :  { %466 = dma.done.wait [#allocation5], 192  }
  0x43   :  { %467 = vsyncadd [#allocation5], 4294967104 }
  0x44   :  { %468 = dma.done.wait [#allocation8], 192  }
  0x45   :  { %469 = vsyncadd [#allocation8], 4294967104 }
  0x46   :  { %470 = dma.done.wait [#allocation11], 128  }
  0x47   :  { %471 = vsyncadd [#allocation11], 4294967168  ;;  %v480_v0 = vmov 0.0   ;;  %vm481_vm0 = vmmov 0   ;;  %vm171_vm1 = vcmask 1043456   ;;  %v341_v1 = vld [vmem:[#allocation7] sm:$0xff]  }
  0x48   :  { %311 = vmatprep.subr.bf16.mxu0 %v480_v0  ;;  %313 = vmatprep.mubr.msk.bf16.mxu0 %vm481_vm0, %v480_v0  ;;  %vm115_vm2 = vcmask 130048   ;;  %v166_v2 = vld [vmem:[#allocation9] sm:$0xf]  ;;  %v105_v3 = vld [vmem:[#allocation2] sm:$0xf]  ;;  %v342_v5 = vld [vmem:[%s574_s4 + $0x8] sm:$0xff]  }
  0x49   :  { %317 = vmatprep.subr.bf16.mxu1 %v480_v0  ;;  %319 = vmatprep.mubr.msk.bf16.mxu1 %vm481_vm0, %v480_v0  ;;  %v173_v4 = vsel %vm171_vm1, %v166_v2, 0  ;;  %v165_v6 = vld [vmem:[#allocation4] sm:$0xf]  ;;  %vm167_vm3 = vcmask 64512   ;;  %v108_v8 = vld [vmem:[#allocation6] sm:$0xff]  ;;  %vm227_vm4 = vcmask 261120  }
  0x4a   :  { %312 = vmatpush3.bf16.msra.mxu0 %v341_v1  ;;  %318 = vmatpush3.bf16.msra.mxu1 %v173_v4  ;;  %v343_v7 = vld [vmem:[%s574_s4] sm:$0xff]   ;;  %vm287_vm5 = vcmask 7168  }
  0x4b   :  { %323 = vmatprep.subr.bf16.mxu0 %v480_v0  ;;  %v303_v21 = vld [vmem:[%s575_s5] ss:$0 sm:$0xff] }
  0x4c   :  { %v280_v26 = vld [vmem:[#allocation10] sm:$0xff] }
  0x4d   :  { %314 = vmatmul.mubr.msk.bf16.vlgmr.msra.gmra.mxu0 %vm115_vm2, %v105_v3  ;;  %320 = vmatmul.mubr.msk.bf16.vlgmr.msra.gmra.mxu1 %vm167_vm3, %v165_v6  ;;  %v285_v31 = vld [vmem:[%s578_s8] sm:$0xff] }
  0x4e   :  { %324 = vmatpush3.bf16.msra.mxu0 %v342_v5  ;;  %327 = vmatprep.mubr.msk.bf16.mxu0 %vm481_vm0, %v480_v0 }
  0x4f   :  { %325 = vmatprep.subr.bf16.mxu0 %v480_v0 }
  0x52   :  { %326 = vmatpush3.bf16.msra.mxu0 %v343_v7 }
 0x10d   :  { %v153_v9 = vpop.f32.mrf.mxu0  ;;  %v209_v16 = vpop.f32.mrf.mxu1 }
 0x10e   :  { %v154_v10 = vadd.f32 %v153_v9, %v108_v8 }
 0x10f   :  { %v315_v11 = vpop.f32.mrf.mxu0  ;;  %v321_v17 = vpop.f32.mrf.mxu1 }
 0x110   :  { %v159_v12 = vmax.f32 %v154_v10, 0.0 }
 0x111   :  { %v156_v13 = vpop.f32.mrf.mxu0  ;;  %v212_v18 = vpop.f32.mrf.mxu1 }
 0x112   :  { %v160_v14 = vpack.c.bf16 %v159_v12, %v159_v12 }
 0x113   :  { %v316_v15 = vpop.f32.mrf.mxu0  ;;  %v322_v19 = vpop.f32.mrf.mxu1 }
 0x114   :  { %328 = vmatmul.mubr.msk.bf16.vlgmr.msra.gmra.mxu0 %vm227_vm4, %v160_v14 }
 0x1d4   :  { %v265_v20 = vpop.f32.mrf.mxu0 }
 0x1d5   :  { %v266_v22 = vadd.f32 %v265_v20, %v209_v16 }
 0x1d6   :  { %v329_v23 = vpop.f32.mrf.mxu0 }
 0x1d7   :  { %v278_v24 = vadd.f32 %v303_v21, %v266_v22 }
 0x1d8   :  { %v268_v25 = vpop.f32.mrf.mxu0 }
 0x1d9   :  { %v279_v27 = vmax.f32 %v278_v24, 0.0 }
 0x1da   :  { %v330_v28 = vpop.f32.mrf.mxu0 }
 0x1db   :  { %v281_v29 = vmul.f32 %v280_v26, %v279_v27 }
 0x1dd   :  { %v282_v30 = vsel %vm227_vm4, %v281_v29, 0.0 }
 0x1de   :  { %283 = vadd.xlane.f32.xlu0 %v282_v30 }
 0x267   :  { %v284_v32 = vpop.xlane.xlu0 %283 }
 0x268   :  { %v286_v33 = vadd.f32 %v285_v31, %v284_v32 }
 0x26a   :  { %288 = vst.msk [vmem:[%s579_s9] sm:$0xff] %vm287_vm5, %v286_v33 }
 0x26b   :  { %293 = vsyncpa [#allocation3], 1 }
 0x26c   :  { %294 = vsyncpa [#allocation5], 1 }
 0x26d   :  { %295 = vsyncpa [#allocation8], 1 }
 0x26e   :  { %296 = vsyncpa [#allocation11], 1 }

</bundles_post_ra>
